<compile_context>
chip_gen: v6e
topology: v6e:2x2x1
jax: 0.10.0
libtpu: 0.0.40
codegen_flags: <defaults>
</compile_context>

<pallas_src>
import functools

import jax
import jax.numpy as jnp
import numpy as np
from jax.experimental import pallas as pl
from jax.experimental.pallas import tpu as pltpu


def _round_up(n: int, m: int) -> int:
    return ((n + m - 1) // m) * m


# ----------------------------------------------------------------------------
# Kernel: per-row mean / unbiased-variance normalization + scalar affine
# ----------------------------------------------------------------------------
def norm_kernel(gb_ref, x_ref, o_ref, *, d, dp, eps):
    gamma = gb_ref[0]                              # f32 scalars (scalar prefetch)
    beta = gb_ref[1]

    x = x_ref[...].astype(jnp.float32)             # (TM, Dp) -> f32 in-register
    if dp != d:                                    # lane-padded path (D % 128 != 0)
        lane = jax.lax.broadcasted_iota(jnp.int32, x.shape, 1)
        valid = lane < d
        x = jnp.where(valid, x, 0.0)               # pad lanes contribute 0

    mu = jnp.sum(x, axis=-1, keepdims=True) * jnp.float32(1.0 / d)
    diff = x - mu
    dsq = diff * diff
    if dp != d:
        dsq = jnp.where(valid, dsq, 0.0)           # keep pad lanes out of variance
    # torch.var default is unbiased: divide by D - 1
    var = jnp.sum(dsq, axis=-1, keepdims=True) * jnp.float32(1.0 / (d - 1))

    scale = gamma * jax.lax.rsqrt(var + jnp.float32(eps))   # EUP rsqrt, gamma folded
    o_ref[...] = (diff * scale + beta).astype(o_ref.dtype)


# ----------------------------------------------------------------------------
# Wrapper
# ----------------------------------------------------------------------------
def norm(x, gamma, beta, *, eps=1e-8, target_step_bytes=2 * 1024 * 1024):
    """x: (B, L, D) f32 or bf16; gamma/beta scalars. Normalizes over dim 2."""
    B, L, D = x.shape
    assert D >= 2, "unbiased variance needs D >= 2"
    M = B * L

    x2 = x.reshape(M, D)

    # Lane-dense last dim: pad to a multiple of 128 only when needed
    # (production BERT hidden=768 takes the no-pad, unmasked path).
    Dp = _round_up(D, 128)
    if Dp != D:
        x2 = jnp.pad(x2, ((0, 0), (0, Dp - D)))

    itemsize = x2.dtype.itemsize

    # Row tile from the per-step HBM-traffic target; always a multiple of 8.
    tm = max(8, _round_up(target_step_bytes // (itemsize * Dp), 8))
    tm = min(tm, _round_up(M, 8))
    # Ensure >= 2 grid steps whenever M permits so the "parallel" axis shards
    # across both v7x TensorCores and the pipeline actually overlaps.
    if tm >= M and M > 8:
        tm = _round_up((M + 1) // 2, 8)
    grid_m = pl.cdiv(M, tm)

    # VMEM budget: double-buffered in/out blocks + a few live f32 temporaries,
    # clamped to 32 MiB (v7x: 64 MiB physical per TC, leave headroom).
    step_bytes = tm * Dp * itemsize
    vmem_need = 4 * step_bytes + 4 * tm * Dp * 4 + (4 << 20)
    vmem_limit = int(min(32 << 20, max(16 << 20, vmem_need)))

    gb = jnp.asarray([gamma, beta], dtype=jnp.float32)      # scalar-prefetch arg

    kern = functools.partial(norm_kernel, d=D, dp=Dp, eps=eps)
    out2 = pl.pallas_call(
        kern,
        out_shape=jax.ShapeDtypeStruct((M, Dp), x2.dtype),
        grid_spec=pltpu.PrefetchScalarGridSpec(
            num_scalar_prefetch=1,
            grid=(grid_m,),
            in_specs=[pl.BlockSpec((tm, Dp), lambda i, gb: (i, 0))],
            out_specs=pl.BlockSpec((tm, Dp), lambda i, gb: (i, 0)),
        ),
        compiler_params=pltpu.CompilerParams(
            dimension_semantics=("parallel",),      # rows independent -> megacore
            vmem_limit_bytes=vmem_limit,
        ),
    )(gb, x2)

    if Dp != D:
        out2 = out2[:, :D]
    return out2.reshape(B, L, D)


# ----------------------------------------------------------------------------
# Pure-JAX reference (mirrors the PyTorch module exactly; math in f32)
# ----------------------------------------------------------------------------
def reference(x, gamma, beta, eps=1e-8):
    x = x.astype(jnp.float32)
    D = x.shape[2]
    mu = jnp.mean(x, axis=2, keepdims=True)
    var = jnp.sum((x - mu) ** 2, axis=2, keepdims=True) / (D - 1)   # unbiased
    return gamma * (x - mu) / jnp.sqrt(var + eps) + beta


# ----------------------------------------------------------------------------
if __name__ == "__main__":
    key = jax.random.PRNGKey(0)
    k1, k2, k3 = jax.random.split(key, 3)

    # Case 1: module-implied small shape (batch=2, seq=8, hidden=32) with the
    # Parameter init values gamma=1, beta=0.  D=32 exercises the pad + lane-mask
    # path; M=16 rows split into 2 grid steps.
    B, L, D = 2, 8, 32
    x = jax.random.normal(k1, (B, L, D), jnp.float32)
    out = jax.block_until_ready(norm(x, 1.0, 0.0))
    ref = reference(x, 1.0, 0.0)
    assert out.shape == (B, L, D)
    assert np.allclose(np.asarray(out), np.asarray(ref), atol=1e-5, rtol=1e-5), (
        "case1 mismatch: max abs diff = %g" % float(jnp.max(jnp.abs(out - ref))))

    # Case 2: lane-dense (D=128) f32, non-trivial gamma/beta, byte-target tiling
    # splits M=384 rows into 2 parallel grid steps.
    B2, L2, D2 = 4, 96, 128
    x2 = jax.random.normal(k2, (B2, L2, D2), jnp.float32)
    out2 = jax.block_until_ready(norm(x2, 1.7, -0.3))
    ref2 = reference(x2, 1.7, -0.3)
    assert out2.shape == (B2, L2, D2)
    assert np.allclose(np.asarray(out2), np.asarray(ref2), atol=1e-5, rtol=1e-5), (
        "case2 mismatch: max abs diff = %g" % float(jnp.max(jnp.abs(out2 - ref2))))

    # Case 3: bf16 in / bf16 out (no wrapper f32 upcast; f32 math in-kernel).
    B3, L3, D3 = 2, 64, 128
    x3 = jax.random.normal(k3, (B3, L3, D3), jnp.float32).astype(jnp.bfloat16)
    out3 = jax.block_until_ready(norm(x3, 1.25, 0.5))
    assert out3.dtype == jnp.bfloat16
    ref3 = reference(x3, 1.25, 0.5)
    out3_f32 = np.asarray(out3.astype(jnp.float32))
    assert np.allclose(out3_f32, np.asarray(ref3), atol=5e-2, rtol=5e-2), (
        "case3 mismatch: max abs diff = %g"
        % float(np.max(np.abs(out3_f32 - np.asarray(ref3)))))

    print("KERNEL_OK")
</pallas_src>

<mosaic_0001>
module attributes {stable_mosaic.version = 11 : i64} {
  func.func @norm_kernel(%arg0: i32, %arg1: memref<2xf32, #tpu.memory_space<smem>>, %arg2: memref<8x128xf32, #tpu.memory_space<vmem>>, %arg3: memref<8x128xf32, #tpu.memory_space<vmem>>) attributes {dimension_semantics = [#tpu.dimension_semantics<parallel>], iteration_bounds = array<i64: 2>, scalar_prefetch = 1 : i64, scratch_operands = 0 : i64, tpu.core_type = #tpu.core_type<tc>, window_params = [{transform_indices = @transform_0, window_bounds = array<i64: 8, 128>}, {transform_indices = @transform_1, window_bounds = array<i64: 8, 128>}]} {
    %c0 = arith.constant 0 : index
    %0 = memref.load %arg1[%c0] : memref<2xf32, #tpu.memory_space<smem>>
    %c1 = arith.constant 1 : index
    %1 = memref.load %arg1[%c1] : memref<2xf32, #tpu.memory_space<smem>>
    %c0_0 = arith.constant 0 : index
    %c0_1 = arith.constant 0 : index
    %2 = vector.load %arg2[%c0_0, %c0_1] : memref<8x128xf32, #tpu.memory_space<vmem>>, vector<8x128xf32>
    %3 = tpu.iota {dimensions = array<i32: 1>} : vector<8x128xi32>
    %c32_i32 = arith.constant 32 : i32
    %4 = vector.broadcast %c32_i32 : i32 to vector<8x128xi32>
    %5 = arith.cmpi slt, %3, %4 : vector<8x128xi32>
    %cst = arith.constant 0.000000e+00 : f32
    %6 = vector.broadcast %cst : f32 to vector<8x128xf32>
    %7 = arith.select %5, %2, %6 : vector<8x128xi1>, vector<8x128xf32>
    %cst_2 = arith.constant dense<0.000000e+00> : vector<8xf32>
    %8 = vector.multi_reduction <add>, %7, %cst_2 [1] : vector<8x128xf32> to vector<8xf32>
    %9 = vector.shape_cast %8 : vector<8xf32> to vector<8x1xf32>
    %cst_3 = arith.constant 3.125000e-02 : f32
    %10 = vector.broadcast %cst_3 : f32 to vector<8x1xf32>
    %11 = arith.mulf %9, %10 : vector<8x1xf32>
    %12 = vector.broadcast %11 : vector<8x1xf32> to vector<8x128xf32>
    %13 = arith.subf %7, %12 : vector<8x128xf32>
    %14 = arith.mulf %13, %13 : vector<8x128xf32>
    %cst_4 = arith.constant 0.000000e+00 : f32
    %15 = vector.broadcast %cst_4 : f32 to vector<8x128xf32>
    %16 = arith.select %5, %14, %15 : vector<8x128xi1>, vector<8x128xf32>
    %cst_5 = arith.constant dense<0.000000e+00> : vector<8xf32>
    %17 = vector.multi_reduction <add>, %16, %cst_5 [1] : vector<8x128xf32> to vector<8xf32>
    %18 = vector.shape_cast %17 : vector<8xf32> to vector<8x1xf32>
    %cst_6 = arith.constant 0.0322580636 : f32
    %19 = vector.broadcast %cst_6 : f32 to vector<8x1xf32>
    %20 = arith.mulf %18, %19 : vector<8x1xf32>
    %cst_7 = arith.constant 9.99999993E-9 : f32
    %21 = vector.broadcast %cst_7 : f32 to vector<8x1xf32>
    %22 = arith.addf %20, %21 : vector<8x1xf32>
    %23 = math.rsqrt %22 : vector<8x1xf32>
    %24 = vector.broadcast %0 : f32 to vector<8x1xf32>
    %25 = arith.mulf %24, %23 : vector<8x1xf32>
    %26 = vector.broadcast %25 : vector<8x1xf32> to vector<8x128xf32>
    %27 = arith.mulf %13, %26 : vector<8x128xf32>
    %28 = vector.broadcast %1 : f32 to vector<8x128xf32>
    %29 = arith.addf %27, %28 : vector<8x128xf32>
    %c0_8 = arith.constant 0 : index
    %c0_9 = arith.constant 0 : index
    %30 = vector.load %arg3[%c0_8, %c0_9] : memref<8x128xf32, #tpu.memory_space<vmem>>, vector<8x128xf32>
    tpu.vector_store %arg3[%c0_8, %c0_9], %29 {strides = array<i32>} : memref<8x128xf32, #tpu.memory_space<vmem>>, vector<8x128xf32>,
    return
  }
  func.func @transform_0(%arg0: i32, %arg1: memref<2xf32, #tpu.memory_space<smem>>) -> (i32, i32) {
    %c0_i32 = arith.constant 0 : i32
    %c0_i32_0 = arith.constant 0 : i32
    return %arg0, %c0_i32 : i32, i32
  }
  func.func @transform_1(%arg0: i32, %arg1: memref<2xf32, #tpu.memory_space<smem>>) -> (i32, i32) {
    %c0_i32 = arith.constant 0 : i32
    %c0_i32_0 = arith.constant 0 : i32
    return %arg0, %c0_i32 : i32, i32
  }
}

</mosaic_0001>

<bundles_post_ra>
// kernel: tpu_custom_call.1
= control target key start
LH: loop header
LB: loop body
LE: loop exit
PB: predicated region body
PF: predicated region fallthrough
CT: control target
= control target key end

     0   :  { %s411_s9 = smov [#allocation3]   ;;  %s573_s0 = inlined_call_operand.hbm [shape: f32[2], index: 0, kind: input, shape index: {}]   ;;  %s574_s1 = inlined_call_operand.hbm [shape: f32[16,128], index: 1, kind: input, shape index: {}]   ;;  %s575_s2 = inlined_call_operand.hbm [shape: f32[16,128], index: 2, kind: output, shape index: {}]  }
   0x1   :  { %8 = dma.hbm_to_smem %s573_s0, 16, %s411_s9, [#allocation2] }
   0x2   :  { %385 = dma.done.wait [#allocation2], 16 }
   0x3   :  { %386 = vsyncadd [#allocation2], 4294967280 }
   0x4   :  { %10 = sfence }
   0x5   :  { %11 = vsyncpa [#allocation5], 0 }
   0x6   :  { %13 = vsyncpa [#allocation5 + $0x1], 0 }
   0x7   :  { %14 = vsyncpa [#allocation6], 0 }
   0x8   :  { %16 = vsyncpa [#allocation6 + $0x1], 0  ;;  %s432_s12 = smov 0   ;;  %s434_s13 = smov 0  }
   0x9   :  { %s436_s14 = smov 0   ;;  %s438_s15 = smov 0  }
   0xa LB: > { %s453_s0 = sadd.s32 4294967295, %s409_s15   ;;  %s245_s16 = sadd.s32 4294967294, %s409_s15   ;;  %s409_s15 = sphi %s438_s15, %s592_s15   ;;  %s405_s14 = sphi %s436_s14, %s591_s14   ;;  %s401_s13 = sphi %s434_s13, %s590_s13   ;;  %s397_s12 = sphi %s432_s12, %s589_s12  }
   0xb   : > { %s457_s17 = sadd.s32 1, %s409_s15   ;;  %s29_s18 = sadd.s32 1, %s405_s14 }
   0xc   : > { %s26_s19 = ssub.s32 %s409_s15, %s457_s17  ;;  %p36_p0 = scmp.ne.s32.totalorder %s405_s14, %s401_s13 }
   0xd   : > { %p27_p1 = scmp.eq.s32.totalorder %s26_s19, 0  ;;  %p37_p2 = scmp.eq.s32.totalorder %s409_s15, 0 }
   0xe   : > { %p42_p3 = scmp.ne.s32.totalorder %s401_s13, %s397_s12  ;;  %p43_p4 = scmp.eq.s32.totalorder %s453_s0, 0 }
   0xf   : > { %s469_s20 = scalar_select %p27_p1, %s405_s14, %s29_s18  }
  0x10   : > { %p471_p5 = por %p37_p2, %p36_p0  ;;  %p475_p6 = por %p43_p4, %p42_p3 }
  0x11   : > { %p66_p7 = scmp.eq.s32.totalorder %s453_s0, 1  ;;  %p72_p8 = scmp.eq.s32.totalorder %s245_s16, 1 }
  0x12   : > { %s579_s22 = scalar_select %p475_p6, 1, 0 }
  0x13   : > { %p270_p10 = scmp.lt.s32.totalorder %s409_s15, 2  ;;  %p482_p11 = por %p66_p7, %p36_p0 }
  0x14   : > { %p486_p12 = por %p72_p8, %p42_p3  ;;  %s92_s25 = sand.u32 1, %s405_s14  }
  0x15   : > { %s580_s23 = scalar_select %p482_p11, 1, 0 }
  0x16   : > { %s581_s24 = scalar_select %p486_p12, 1, 0 }
  0x17   : > { %s249_s26 = sshll.u32 %s409_s15, 7  ;;  %s248_s27 = sshll.u32 %s92_s25, 3 }
  0x18   : > { %s495_s30 = scalar_lea.hbm %s574_s1, %s249_s26  ;;  %s96_s3 = scalar_lea.vmem [#allocation4], %s248_s27 }
  0x19   : > { %s103_s4 = sshll.u32 %s96_s3, 4  ;;  %p499_p13 = pnand %p270_p10, %p471_p5  ;;  %s503_s4 = int_to_ptr.vmem [resolvable:$true] %s103_s4 }
  0x1a   : > { %s93_s6 = scalar_lea.sflag [#allocation5], %s92_s25  ;;  %s315_s7 = scalar_lea.hbm %s495_s30, 128 }
  0x1b   : > { %p316_p2 = scmp.ne.s32.totalorder %s495_s30, %s315_s7  ;;  %p317_p3 = pneg %p499_p13 }
  0x1c   : > { %s320_s10 = scalar_lea.hbm %s574_s1, 256  ;;  %p321_p5 = scmp.lt.s32.totalorder %s495_s30, %s574_s1 }
  0x1d   : > { %p318_p4 = pnand %p317_p3, %p316_p2  ;;  %p322_p8 = scmp.lt.s32.totalorder %s320_s10, %s315_s7 }
  0x1f   : > { %p319_p7 = pneg %p318_p4  ;;  %p323_p10 = por %p322_p8, %p321_p5 }
  0x21   : > { %p324_p9 = pnand %p323_p10, %p319_p7 }
  0x23   : > { %327 = shalt.err (!%p324_p9)
}
  0x24   : > { %s328_s18 = scalar_lea.vmem %s503_s4, 128  ;;  %s412_s19 = smov [#allocation4]  }
  0x25   : > { %p329_p0 = scmp.ne.s32.totalorder %s503_s4, %s328_s18  ;;  %s333_s21 = sshll.u32 %s412_s19, 4  ;;  %s334_s21 = int_to_ptr.vmem [resolvable:$false] %s333_s21 }
  0x26   : > { %s335_s25 = scalar_lea.vmem %s334_s21, 256  ;;  %p336_p4 = scmp.lt.s32.totalorder %s503_s4, %s334_s21 }
  0x27   : > { %p331_p1 = pnand %p329_p0, %p317_p3  ;;  %p337_p12 = scmp.lt.s32.totalorder %s335_s25, %s328_s18 }
  0x29   : > { %p332_p2 = pneg %p331_p1  ;;  %p338_p11 = por %p337_p12, %p336_p4 }
  0x2b   : > { %p339_p6 = pnand %p338_p11, %p332_p2 }
  0x2d   : > { %342 = shalt.err (!%p339_p6)
}
  0x2e   : > { %265 = dma.hbm_to_vmem [thread:$0]  (!%p499_p13), %s495_s30, 128, %s503_s4, %s93_s6  }
  0x2f   : > { %p583_p9 = scmp.lt.s32.totalorder %s409_s15, 3  ;;  %p584_p7 = scmp.ge.s32.totalorder %s409_s15, 1 }
  0x31   : > { %p109_p0 = pnand %p584_p7, %p583_p9 }
  0x32   : > { %s530_s26 = sand.u32 (!%p109_p0), 1, %s401_s13   ;;  %p585_p6 = scmp.ne.s32.totalorder (!%p109_p0), %s579_s22, 0 }
  0x33   : > { %112 = sbr.rel (%p109_p0) target bundleno = 383 (0x17f), region = 24  ;;  %s251_s27 = sshll.u32 (!%p109_p0), %s530_s26, 3 }
  0x34   : > { %s115_s28 = scalar_lea.sflag (!%p109_p0), [#allocation5], %s530_s26  ;;  %s118_s29 = scalar_lea.vmem (!%p109_p0), [#allocation4], %s251_s27 }
  0x38   : > { %388 = dma.done.wait (%p585_p6), %s115_s28, 128  }
  0x39   : > { %390 = vsyncadd (%p585_p6), %s115_s28, 4294967168  ;;  %v140_v0 = vlaneseq  ;;  %v139_v2 = vld [vmem:[%s118_s29] sm:$0xff]  ;;  %s137_s22 = sld [smem:[#allocation3]]  ;;  %s255_s3 = sshll.u32 %s453_s0, 7 }
  0x3a   : > { %s253_s30 = sld [smem:[#allocation3 + $0x1]]  ;;  %s136_s4 = scalar_lea.vmem [#allocation7], %s251_s27 }
  0x3b   : > { %v141_v1 = vand.u32 127, %v140_v0  ;;  %s175_s5 = sshll.u32 %s136_s4, 4  ;;  %s173_s8 = scalar_lea.hbm %s575_s2, %s255_s3  ;;  %s176_s5 = int_to_ptr.vmem [resolvable:$true] %s175_s5 }
  0x3c   : > { %s162_s9 = scalar_lea.sflag [#allocation6], %s530_s26  ;;  %s343_s10 = scalar_lea.vmem %s176_s5, 128 }
  0x3d   : > { %vm142_vm0 = vcmp.lt.s32.totalorder %v141_v1, 32  ;;  %p344_p11 = scmp.ne.s32.totalorder %s176_s5, %s343_s10  ;;  %p586_p12 = scmp.ne.s32.totalorder %s580_s23, 0 }
  0x3e   : > { %v143_v3 = vsel %vm142_vm0, %v139_v2, 0.0  ;;  %s413_s11 = smov [#allocation7]  }
  0x3f   : > { %144 = vadd.xlane.f32.xlu0 %v143_v3  ;;  %v155_v12 = vstv %s137_s22  ;;  %p345_p13 = pnand %p344_p11, %p586_p12  ;;  %s347_s16 = sshll.u32 %s413_s11, 4  ;;  %s348_s16 = int_to_ptr.vmem [resolvable:$false] %s347_s16 }
  0x40   : > { %v158_v15 = vstv %s253_s30  ;;  %s349_s0 = scalar_lea.vmem %s348_s16, 256  ;;  %p350_p3 = scmp.lt.s32.totalorder %s176_s5, %s348_s16 }
  0x41   : > { %p346_p1 = pneg %p345_p13  ;;  %p351_p5 = scmp.lt.s32.totalorder %s349_s0, %s343_s10 }
  0x43   : > { %p352_p8 = por %p351_p5, %p350_p3 }
  0x45   : > { %p353_p10 = pnand %p352_p8, %p346_p1 }
  0xc8   : > { %v145_v4 = vpop.xlane.xlu0 %144 }
  0xc9   : > { %v146_v5 = vmul.f32 0.03125, %v145_v4 }
  0xcb   : > { %v147_v6 = vsub.f32 %v143_v3, %v146_v5 }
  0xcd   : > { %v148_v7 = vmul.f32 %v147_v6, %v147_v6 }
  0xcf   : > { %v149_v8 = vsel %vm142_vm0, %v148_v7, 0.0 }
  0xd0   : > { %150 = vadd.xlane.f32.xlu0 %v149_v8 }
 0x159   : > { %v151_v9 = vpop.xlane.xlu0 %150 }
 0x15a   : > { %v152_v10 = vmul.f32 0.032258064, %v151_v9 }
 0x15c   : > { %v153_v11 = vadd.f32 1e-08, %v152_v10 }
 0x15e   : > { %305 = vrsqrt.f32 %v153_v11 }
 0x16b   : > { %v306_v13 = vpop.eup %305 }
 0x16c   : > { %v156_v14 = vmul.f32 %v306_v13, %v155_v12 }
 0x16e   : > { %v157_v16 = vmul.f32 %v156_v14, %v147_v6 }
 0x170   : > { %v159_v17 = vadd.f32 %v158_v15, %v157_v16 }
 0x172   : > { %160 = vst [vmem:[%s136_s4] sm:$0xff] %v159_v17 }
 0x173   : > { %356 = shalt.err (!%p353_p10)
}
 0x174   : > { %s357_s18 = scalar_lea.hbm %s173_s8, 128  ;;  %s361_s25 = scalar_lea.hbm %s575_s2, 256 }
 0x175   : > { %p358_p2 = scmp.ne.s32.totalorder %s173_s8, %s357_s18  ;;  %p362_p7 = scmp.lt.s32.totalorder %s173_s8, %s575_s2 }
 0x176   : > { %p363_p0 = scmp.lt.s32.totalorder %s361_s25, %s357_s18 }
 0x177   : > { %p359_p4 = pnand %p358_p2, %p586_p12 }
 0x178   : > { %p364_p6 = por %p363_p0, %p362_p7 }
 0x179   : > { %p360_p9 = pneg %p359_p4 }
 0x17b   : > { %p365_p11 = pnand %p364_p6, %p360_p9 }
 0x17d   : > { %368 = shalt.err (!%p365_p11)
}
 0x17e   : > { %260 = dma.vmem_to_hbm [thread:$0]  (%p586_p12), %s176_s5, 128, %s173_s8, %s162_s9  }
 0x17f PF: > { %s187_s28 = sand.u32 1, %s397_s12   ;;  %p587_p13 = scmp.ne.s32.totalorder %s581_s24, 0 }
 0x180   : > { %p588_p1 = scmp.ge.s32.totalorder %s409_s15, 2  ;;  %s188_s29 = scalar_lea.sflag [#allocation6], %s187_s28 }
 0x182   : > { %p267_p3 = pnand %p588_p1, %p587_p13 }
 0x184   : > { %p268_p5 = pneg %p267_p3 }
 0x186   : > { %392 = dma.done.wait (%p268_p5), %s188_s29, 128  }
 0x187   : > { %394 = vsyncadd (%p268_p5), %s188_s29, 4294967168  ;;  %p19_p8 = scmp.ge.s32.totalorder %s457_s17, 4   ;;  %s589_s12 = smov %s401_s13 }
 0x188   : > { %s590_s13 = smov %s405_s14  ;;  %s591_s14 = smov %s469_s20 }
 0x189   : > { %s592_s15 = smov %s457_s17  ;;  %21 = sbr.rel (!%p19_p8) target bundleno = 10 (0xa), region = 69 }
 0x18e   :  { %193 = vsyncpa [#allocation5], 1 }
 0x18f   :  { %195 = vsyncpa [#allocation5 + $0x1], 1 }
 0x190   :  { %196 = vsyncpa [#allocation6], 1 }
 0x191   :  { %198 = vsyncpa [#allocation6 + $0x1], 1 }

</bundles_post_ra>
